<compile_context>
chip_gen: v5e
topology: v5e:2x2
jax: 0.10.0
libtpu: 0.0.40
codegen_flags: <defaults>
</compile_context>

<pallas_src>
import functools
import numpy as np
import jax
import jax.numpy as jnp
from jax.experimental import pallas as pl
from jax.experimental.pallas import tpu as pltpu

LN_EPS = 1e-5  # PyTorch nn.LayerNorm default


# ---------------------------------------------------------------------------
# Fused kernel: one encoder layer per grid step on a VMEM-resident activation.
# Grid = (batch_blocks, n_layers); the output block (constant index along the
# layer axis) doubles as the resident activation buffer.
# ---------------------------------------------------------------------------
def transformer_encoder_kernel(x_ref,
                               wqkv_ref, bqkv_ref, wo_ref, bo_ref,
                               g1_ref, be1_ref,
                               wf1_ref, bf1_ref, wf2_ref, bf2_ref,
                               g2_ref, be2_ref,
                               out_ref,
                               *, n_heads, h_dim, seq_len):
    layer = pl.program_id(1)

    @pl.when(layer == 0)
    def _():
        # x already has the positional encoding folded in (wrapper); dropout = identity.
        out_ref[...] = x_ref[...]

    h = out_ref[...]                            # [M, E] f32 resident activation (M = Bt*S)
    m_rows, e_dim = h.shape
    bt = m_rows // seq_len
    nh_hd = n_heads * h_dim
    scale = 1.0 / (h_dim ** 0.5)
    mxu_dtype = wqkv_ref.dtype                  # bf16 MXU operands, f32 accumulation

    # ---- multi-head attention: one fused QKV projection for all heads -----------------
    qkv = jnp.dot(h.astype(mxu_dtype), wqkv_ref[0],
                  preferred_element_type=jnp.float32) + bqkv_ref[0]      # [M, 3*Nh*H] f32

    ctx_heads = []
    for hd in range(n_heads):                   # tiny static unroll (scores are per-head)
        q = qkv[:, hd * h_dim:(hd + 1) * h_dim].reshape(bt, seq_len, h_dim)
        k = qkv[:, nh_hd + hd * h_dim:nh_hd + (hd + 1) * h_dim].reshape(bt, seq_len, h_dim)
        v = qkv[:, 2 * nh_hd + hd * h_dim:2 * nh_hd + (hd + 1) * h_dim].reshape(bt, seq_len, h_dim)

        # batched over batch rows; contracts last dims (no materialized transpose)
        s = jnp.einsum('bqh,bkh->bqk', q.astype(mxu_dtype), k.astype(mxu_dtype),
                       preferred_element_type=jnp.float32) * scale       # [Bt, S, S] f32
        s = s - jnp.max(s, axis=-1, keepdims=True)
        e = jnp.exp(s)
        denom = jnp.sum(e, axis=-1, keepdims=True)
        inv = pl.reciprocal(denom, approx=True)       # EUP slot (otherwise idle)
        inv = inv * (2.0 - denom * inv)               # one Newton step -> ~f32 accuracy
        a = e * inv                                   # softmax, f32

        ctx = jnp.einsum('bqk,bkh->bqh', a.astype(mxu_dtype), v.astype(mxu_dtype),
                         preferred_element_type=jnp.float32)             # [Bt, S, H] f32
        ctx_heads.append(ctx.reshape(m_rows, h_dim))

    # ONE full-contraction-width output projection instead of Nh small-K matmuls.
    ctx_all = jnp.concatenate(ctx_heads, axis=-1)                        # [M, Nh*H]
    attn = jnp.dot(ctx_all.astype(mxu_dtype), wo_ref[0],
                   preferred_element_type=jnp.float32) + bo_ref[0]       # [M, E]

    def layer_norm(y, g, b):
        # single-pass: mu and E[y^2] in one sweep, var = E[y^2] - mu^2
        mu = jnp.mean(y, axis=-1, keepdims=True)
        ms = jnp.mean(y * y, axis=-1, keepdims=True)
        var = ms - mu * mu
        return (y - mu) * jax.lax.rsqrt(var + LN_EPS) * g + b

    h1 = layer_norm(h + attn, g1_ref[0], be1_ref[0])

    # ---- feed-forward ------------------------------------------------------------------
    ff = jnp.dot(h1.astype(mxu_dtype), wf1_ref[0],
                 preferred_element_type=jnp.float32) + bf1_ref[0]
    ff = jnp.maximum(ff, 0.0)
    ff2 = jnp.dot(ff.astype(mxu_dtype), wf2_ref[0],
                  preferred_element_type=jnp.float32) + bf2_ref[0]

    # Written every layer, but the block index is constant along the layer axis so the
    # HBM writeback only happens once, at the end of the layer sweep.
    out_ref[...] = layer_norm(h1 + ff2, g2_ref[0], be2_ref[0])


def _vmem_limit_bytes():
    # Generation-aware scoped-VMEM budget: ~3/4 of physical VMEM
    # (v5e/v6e 128 MiB -> 96 MiB, v7x 64 MiB -> 48 MiB), fallback 64 MiB.
    try:
        return int(pltpu.get_tpu_info().vmem_capacity_bytes) * 3 // 4
    except Exception:
        return 64 * 1024 * 1024


# ---------------------------------------------------------------------------
# Wrapper: single pallas_call over all layers.
# ---------------------------------------------------------------------------
def transformer_encoder(x, stacked_params, *, n_heads, h_dim, block_batch=None):
    B, S, E = x.shape
    n_layers = stacked_params[0].shape[0]
    if block_batch is None:
        # >=2 batch blocks when possible so the "parallel" axis can use both v7x cores.
        block_batch = B // 2 if (B >= 2 and B % 2 == 0) else B
    assert B % block_batch == 0
    M = block_batch * S                       # matmul M dim per program (multiple of 8)

    # Fold positional encoding in the wrapper (dropout = identity); this buffer is
    # aliased to the output so no extra HBM allocation / PE streaming is needed.
    xpe = (x + positional_encoding(S, E)[None]).reshape(B * S, E).astype(jnp.float32)

    kernel = functools.partial(transformer_encoder_kernel,
                               n_heads=n_heads, h_dim=h_dim, seq_len=S)

    act_spec = pl.BlockSpec((M, E), lambda i, l: (i, 0))   # constant along layer axis
    in_specs = [act_spec]
    for p in stacked_params:                                # stream layer l's weights
        blk = (1,) + p.shape[1:]
        in_specs.append(pl.BlockSpec(blk, lambda i, l, nd=p.ndim: (l,) + (0,) * (nd - 1)))

    out = pl.pallas_call(
        kernel,
        out_shape=jax.ShapeDtypeStruct((B * S, E), jnp.float32),
        grid_spec=pltpu.PrefetchScalarGridSpec(
            num_scalar_prefetch=0,
            grid=(B // block_batch, n_layers),   # (parallel batch blocks, arbitrary layers)
            in_specs=in_specs,
            out_specs=act_spec,                  # resident activation / accumulator
        ),
        input_output_aliases={0: 0},             # reuse the (x + PE) HBM buffer for output
        compiler_params=pltpu.CompilerParams(
            dimension_semantics=("parallel", "arbitrary"),
            vmem_limit_bytes=_vmem_limit_bytes(),
        ),
    )(xpe, *stacked_params)
    return out.reshape(B, S, E)


# ---------------------------------------------------------------------------
# Plain-JAX glue: positional encoding + parameter init / packing
# ---------------------------------------------------------------------------
def positional_encoding(S, E):
    pos = jnp.arange(S, dtype=jnp.float32)[:, None]
    div = 10000.0 ** (jnp.arange(0, E, 2, dtype=jnp.float32) / E)
    pe = jnp.zeros((S, E), jnp.float32)
    pe = pe.at[:, 0::2].set(jnp.sin(pos / div))
    pe = pe.at[:, 1::2].set(jnp.cos(pos / div))
    return pe


def _init_linear(key, fan_in, fan_out):
    kw, kb = jax.random.split(key)
    bound = 1.0 / np.sqrt(fan_in)
    w = jax.random.uniform(kw, (fan_in, fan_out), jnp.float32, -bound, bound)
    b = jax.random.uniform(kb, (fan_out,), jnp.float32, -bound, bound)
    return w, b


def init_layer_params(key, e_dim, h_dim, n_heads):
    # NOTE: for production sizes choose E, Nh*H, ff_dim as multiples of 128 (256 on
    # v6e/v7x) so all packed last dims are lane-dense.
    ff_dim = e_dim // 2
    keys = jax.random.split(key, 3 * n_heads + 3)
    wq, bq, wk, bk, wv, bv = [], [], [], [], [], []
    for h in range(n_heads):
        w, b = _init_linear(keys[3 * h + 0], e_dim, h_dim); wq.append(w); bq.append(b)
        w, b = _init_linear(keys[3 * h + 1], e_dim, h_dim); wk.append(w); bk.append(b)
        w, b = _init_linear(keys[3 * h + 2], e_dim, h_dim); wv.append(w); bv.append(b)
    # fused QKV weight [E, 3*Nh*H]: column blocks [Q heads | K heads | V heads], head-major
    w_qkv = jnp.concatenate([jnp.concatenate(wq, axis=1),
                             jnp.concatenate(wk, axis=1),
                             jnp.concatenate(wv, axis=1)], axis=1)
    b_qkv = jnp.concatenate([jnp.concatenate(bq), jnp.concatenate(bk),
                             jnp.concatenate(bv)])[None, :]              # (1, 3*Nh*H)
    # output projection packed flat (Nh*H, E) -> single matmul in-kernel
    w_o, bo = _init_linear(keys[3 * n_heads + 0], n_heads * h_dim, e_dim)
    b_o = bo[None, :]
    g1 = jnp.ones((1, e_dim), jnp.float32); be1 = jnp.zeros((1, e_dim), jnp.float32)
    w_f1, b_f1 = _init_linear(keys[3 * n_heads + 1], e_dim, ff_dim)
    w_f2, b_f2 = _init_linear(keys[3 * n_heads + 2], ff_dim, e_dim)
    b_f1 = b_f1[None, :]; b_f2 = b_f2[None, :]
    g2 = jnp.ones((1, e_dim), jnp.float32); be2 = jnp.zeros((1, e_dim), jnp.float32)
    return (w_qkv, b_qkv, w_o, b_o, g1, be1, w_f1, b_f1, w_f2, b_f2, g2, be2)


_MATMUL_WEIGHT_IDX = (0, 2, 6, 8)   # w_qkv, w_o, w_f1, w_f2


def stack_layer_params(per_layer, mxu_dtype=jnp.bfloat16):
    """Stack each parameter across layers; matmul weights stored in bf16 (MXU operands),
    biases / LayerNorm params kept in f32 (VPU elementwise)."""
    stacked = [jnp.stack(ps, axis=0) for ps in zip(*per_layer)]
    return tuple(p.astype(mxu_dtype) if i in _MATMUL_WEIGHT_IDX else p.astype(jnp.float32)
                 for i, p in enumerate(stacked))


# ---------------------------------------------------------------------------
# Pure-JAX reference (same packed params and the same bf16-operand / f32-accumulate
# matmul policy as the kernel) for a tight correctness check.
# ---------------------------------------------------------------------------
def _layer_norm_ref(y, g, b):
    mu = jnp.mean(y, axis=-1, keepdims=True)
    var = jnp.mean((y - mu) ** 2, axis=-1, keepdims=True)
    return (y - mu) / jnp.sqrt(var + LN_EPS) * g + b


def transformer_encoder_ref(x, stacked_params, *, n_heads, h_dim):
    B, S, E = x.shape
    nh_hd = n_heads * h_dim
    x = x + positional_encoding(S, E)[None]
    n_layers = stacked_params[0].shape[0]
    for l in range(n_layers):
        (w_qkv, b_qkv, w_o, b_o, g1, be1,
         w_f1, b_f1, w_f2, b_f2, g2, be2) = [p[l] for p in stacked_params]
        cd = w_qkv.dtype                           # matmul-operand dtype (bf16)
        qkv = jnp.dot(x.astype(cd), w_qkv, preferred_element_type=jnp.float32) + b_qkv
        q = qkv[..., :nh_hd].reshape(B, S, n_heads, h_dim)
        k = qkv[..., nh_hd:2 * nh_hd].reshape(B, S, n_heads, h_dim)
        v = qkv[..., 2 * nh_hd:].reshape(B, S, n_heads, h_dim)
        s = jnp.einsum('bqnh,bknh->bnqk', q.astype(cd), k.astype(cd),
                       preferred_element_type=jnp.float32) / (h_dim ** 0.5)
        a = jax.nn.softmax(s, axis=-1)
        ctx = jnp.einsum('bnqk,bknh->bqnh', a.astype(cd), v.astype(cd),
                         preferred_element_type=jnp.float32).reshape(B, S, nh_hd)
        attn = jnp.dot(ctx.astype(cd), w_o, preferred_element_type=jnp.float32) + b_o
        h1 = _layer_norm_ref(x + attn, g1, be1)
        ff = jnp.maximum(jnp.dot(h1.astype(cd), w_f1,
                                 preferred_element_type=jnp.float32) + b_f1, 0.0)
        ff2 = jnp.dot(ff.astype(cd), w_f2, preferred_element_type=jnp.float32) + b_f2
        x = _layer_norm_ref(h1 + ff2, g2, be2)
    return x


# ---------------------------------------------------------------------------
if __name__ == "__main__":
    B, S, E, H, N_HEADS, N_LAYERS = 2, 8, 32, 16, 2, 2

    key = jax.random.PRNGKey(0)
    k_x, k_p = jax.random.split(key)
    x = jax.random.normal(k_x, (B, S, E), jnp.float32)

    layer_keys = jax.random.split(k_p, N_LAYERS)
    per_layer = [init_layer_params(k, E, H, N_HEADS) for k in layer_keys]
    stacked = stack_layer_params(per_layer)

    out = transformer_encoder(x, stacked, n_heads=N_HEADS, h_dim=H)
    out = jax.block_until_ready(out)

    ref = transformer_encoder_ref(x, stacked, n_heads=N_HEADS, h_dim=H)
    np.testing.assert_allclose(np.asarray(out), np.asarray(ref), rtol=2e-3, atol=2e-3)

    print("KERNEL_OK")
</pallas_src>

<mosaic_0001>
module attributes {stable_mosaic.version = 11 : i64} {
  func.func @transformer_encoder_kernel(%arg0: i32, %arg1: i32, %arg2: memref<8x32xf32, #tpu.memory_space<vmem>>, %arg3: memref<1x32x96xbf16, #tpu.memory_space<vmem>>, %arg4: memref<1x1x96xf32, #tpu.memory_space<vmem>>, %arg5: memref<1x32x32xbf16, #tpu.memory_space<vmem>>, %arg6: memref<1x1x32xf32, #tpu.memory_space<vmem>>, %arg7: memref<1x1x32xf32, #tpu.memory_space<vmem>>, %arg8: memref<1x1x32xf32, #tpu.memory_space<vmem>>, %arg9: memref<1x32x16xbf16, #tpu.memory_space<vmem>>, %arg10: memref<1x1x16xf32, #tpu.memory_space<vmem>>, %arg11: memref<1x16x32xbf16, #tpu.memory_space<vmem>>, %arg12: memref<1x1x32xf32, #tpu.memory_space<vmem>>, %arg13: memref<1x1x32xf32, #tpu.memory_space<vmem>>, %arg14: memref<1x1x32xf32, #tpu.memory_space<vmem>>, %arg15: memref<8x32xf32, #tpu.memory_space<vmem>>) attributes {dimension_semantics = [#tpu.dimension_semantics<parallel>, #tpu.dimension_semantics<arbitrary>], iteration_bounds = array<i64: 2, 2>, scalar_prefetch = 0 : i64, scratch_operands = 0 : i64, tpu.core_type = #tpu.core_type<tc>, window_params = [{transform_indices = @transform_0, window_bounds = array<i64: 8, 32>}, {transform_indices = @transform_1, window_bounds = array<i64: 1, 32, 96>}, {transform_indices = @transform_2, window_bounds = array<i64: 1, 1, 96>}, {transform_indices = @transform_3, window_bounds = array<i64: 1, 32, 32>}, {transform_indices = @transform_4, window_bounds = array<i64: 1, 1, 32>}, {transform_indices = @transform_5, window_bounds = array<i64: 1, 1, 32>}, {transform_indices = @transform_6, window_bounds = array<i64: 1, 1, 32>}, {transform_indices = @transform_7, window_bounds = array<i64: 1, 32, 16>}, {transform_indices = @transform_8, window_bounds = array<i64: 1, 1, 16>}, {transform_indices = @transform_9, window_bounds = array<i64: 1, 16, 32>}, {transform_indices = @transform_10, window_bounds = array<i64: 1, 1, 32>}, {transform_indices = @transform_11, window_bounds = array<i64: 1, 1, 32>}, {transform_indices = @transform_12, window_bounds = array<i64: 1, 1, 32>}, {transform_indices = @transform_13, window_bounds = array<i64: 8, 32>}]} {
    %c0_i32 = arith.constant 0 : i32
    %0 = arith.cmpi eq, %arg1, %c0_i32 : i32
    %1 = arith.extui %0 : i1 to i32
    %c0_i32_0 = arith.constant 0 : i32
    %2 = arith.cmpi ne, %1, %c0_i32_0 : i32
    scf.if %2 {
      %c0_66 = arith.constant 0 : index
      %c0_67 = arith.constant 0 : index
      %152 = vector.load %arg2[%c0_66, %c0_67] : memref<8x32xf32, #tpu.memory_space<vmem>>, vector<8x32xf32>
      %c0_68 = arith.constant 0 : index
      %c0_69 = arith.constant 0 : index
      %153 = vector.load %arg15[%c0_68, %c0_69] : memref<8x32xf32, #tpu.memory_space<vmem>>, vector<8x32xf32>
      tpu.vector_store %arg15[%c0_68, %c0_69], %152 {strides = array<i32>} : memref<8x32xf32, #tpu.memory_space<vmem>>, vector<8x32xf32>,
    } else {
    }
    %c0 = arith.constant 0 : index
    %c0_1 = arith.constant 0 : index
    %3 = vector.load %arg15[%c0, %c0_1] : memref<8x32xf32, #tpu.memory_space<vmem>>, vector<8x32xf32>
    %4 = arith.truncf %3 : vector<8x32xf32> to vector<8x32xbf16>
    %c0_2 = arith.constant 0 : index
    %c0_3 = arith.constant 0 : index
    %c0_4 = arith.constant 0 : index
    %5 = vector.load %arg3[%c0_2, %c0_3, %c0_4] : memref<1x32x96xbf16, #tpu.memory_space<vmem>>, vector<1x32x96xbf16>
    %6 = vector.shape_cast %5 : vector<1x32x96xbf16> to vector<32x96xbf16>
    %cst = arith.constant dense<0.000000e+00> : vector<8x96xf32>
    %7 = tpu.matmul %4, %6, %cst {dimension_numbers = #tpu.dot_dimension_numbers<[1], [0], [0], [1], [0, 0, 1, 1], [], []>} : vector<8x32xbf16>, vector<32x96xbf16>, vector<8x96xf32> -> vector<8x96xf32>
    %c0_5 = arith.constant 0 : index
    %c0_6 = arith.constant 0 : index
    %c0_7 = arith.constant 0 : index
    %8 = vector.load %arg4[%c0_5, %c0_6, %c0_7] : memref<1x1x96xf32, #tpu.memory_space<vmem>>, vector<1x1x96xf32>
    %9 = vector.shape_cast %8 : vector<1x1x96xf32> to vector<1x96xf32>
    %10 = vector.broadcast %9 : vector<1x96xf32> to vector<8x96xf32>
    %11 = arith.addf %7, %10 : vector<8x96xf32>
    %12 = vector.extract_strided_slice %11 {offsets = [0, 0], sizes = [8, 16], strides = [1, 1]} : vector<8x96xf32> to vector<8x16xf32>
    %13 = vector.shape_cast %12 : vector<8x16xf32> to vector<1x8x16xf32>
    %14 = vector.extract_strided_slice %11 {offsets = [0, 32], sizes = [8, 16], strides = [1, 1]} : vector<8x96xf32> to vector<8x16xf32>
    %15 = vector.shape_cast %14 : vector<8x16xf32> to vector<1x8x16xf32>
    %16 = vector.extract_strided_slice %11 {offsets = [0, 64], sizes = [8, 16], strides = [1, 1]} : vector<8x96xf32> to vector<8x16xf32>
    %17 = vector.shape_cast %16 : vector<8x16xf32> to vector<1x8x16xf32>
    %18 = arith.truncf %13 : vector<1x8x16xf32> to vector<1x8x16xbf16>
    %19 = arith.truncf %15 : vector<1x8x16xf32> to vector<1x8x16xbf16>
    "tpu.trace_start"() <{level = 10 : i32, message = "bqh,bkh->bqk"}> : () -> ()
    %cst_8 = arith.constant dense<0.000000e+00> : vector<1x8x8xf32>
    %20 = tpu.matmul %18, %19, %cst_8 {dimension_numbers = #tpu.dot_dimension_numbers<[2], [2], [1], [1], [0, 0, 0, 1, 1, 1], [0], [0]>} : vector<1x8x16xbf16>, vector<1x8x16xbf16>, vector<1x8x8xf32> -> vector<1x8x8xf32>
    "tpu.trace_stop"() : () -> ()
    %cst_9 = arith.constant 2.500000e-01 : f32
    %21 = vector.broadcast %cst_9 : f32 to vector<1x8x8xf32>
    %22 = arith.mulf %20, %21 : vector<1x8x8xf32>
    %cst_10 = arith.constant dense<0xFF800000> : vector<1x8xf32>
    %23 = vector.multi_reduction <maximumf>, %22, %cst_10 [2] : vector<1x8x8xf32> to vector<1x8xf32>
    %24 = vector.shape_cast %23 : vector<1x8xf32> to vector<1x8x1xf32>
    %25 = vector.broadcast %24 : vector<1x8x1xf32> to vector<1x8x8xf32>
    %26 = arith.subf %22, %25 : vector<1x8x8xf32>
    %27 = math.exp %26 : vector<1x8x8xf32>
    %cst_11 = arith.constant dense<0.000000e+00> : vector<1x8xf32>
    %28 = vector.multi_reduction <add>, %27, %cst_11 [2] : vector<1x8x8xf32> to vector<1x8xf32>
    %29 = vector.shape_cast %28 : vector<1x8xf32> to vector<1x8x1xf32>
    %30 = tpu.reciprocal %29 {approx = true} : vector<1x8x1xf32> -> vector<1x8x1xf32>
    %31 = arith.mulf %29, %30 : vector<1x8x1xf32>
    %cst_12 = arith.constant 2.000000e+00 : f32
    %32 = vector.broadcast %cst_12 : f32 to vector<1x8x1xf32>
    %33 = arith.subf %32, %31 : vector<1x8x1xf32>
    %34 = arith.mulf %30, %33 : vector<1x8x1xf32>
    %35 = vector.broadcast %34 : vector<1x8x1xf32> to vector<1x8x8xf32>
    %36 = arith.mulf %27, %35 : vector<1x8x8xf32>
    %37 = arith.truncf %36 : vector<1x8x8xf32> to vector<1x8x8xbf16>
    %38 = arith.truncf %17 : vector<1x8x16xf32> to vector<1x8x16xbf16>
    "tpu.trace_start"() <{level = 10 : i32, message = "bqk,bkh->bqh"}> : () -> ()
    %cst_13 = arith.constant dense<0.000000e+00> : vector<1x8x16xf32>
    %39 = tpu.matmul %37, %38, %cst_13 {dimension_numbers = #tpu.dot_dimension_numbers<[2], [1], [1], [2], [0, 0, 0, 1, 1, 2], [0], [0]>} : vector<1x8x8xbf16>, vector<1x8x16xbf16>, vector<1x8x16xf32> -> vector<1x8x16xf32>
    "tpu.trace_stop"() : () -> ()
    %40 = vector.shape_cast %39 : vector<1x8x16xf32> to vector<8x16xf32>
    %41 = vector.extract_strided_slice %11 {offsets = [0, 16], sizes = [8, 16], strides = [1, 1]} : vector<8x96xf32> to vector<8x16xf32>
    %42 = vector.shape_cast %41 : vector<8x16xf32> to vector<1x8x16xf32>
    %43 = vector.extract_strided_slice %11 {offsets = [0, 48], sizes = [8, 16], strides = [1, 1]} : vector<8x96xf32> to vector<8x16xf32>
    %44 = vector.shape_cast %43 : vector<8x16xf32> to vector<1x8x16xf32>
    %45 = vector.extract_strided_slice %11 {offsets = [0, 80], sizes = [8, 16], strides = [1, 1]} : vector<8x96xf32> to vector<8x16xf32>
    %46 = vector.shape_cast %45 : vector<8x16xf32> to vector<1x8x16xf32>
    %47 = arith.truncf %42 : vector<1x8x16xf32> to vector<1x8x16xbf16>
    %48 = arith.truncf %44 : vector<1x8x16xf32> to vector<1x8x16xbf16>
    "tpu.trace_start"() <{level = 10 : i32, message = "bqh,bkh->bqk"}> : () -> ()
    %cst_14 = arith.constant dense<0.000000e+00> : vector<1x8x8xf32>
    %49 = tpu.matmul %47, %48, %cst_14 {dimension_numbers = #tpu.dot_dimension_numbers<[2], [2], [1], [1], [0, 0, 0, 1, 1, 1], [0], [0]>} : vector<1x8x16xbf16>, vector<1x8x16xbf16>, vector<1x8x8xf32> -> vector<1x8x8xf32>
    "tpu.trace_stop"() : () -> ()
    %cst_15 = arith.constant 2.500000e-01 : f32
    %50 = vector.broadcast %cst_15 : f32 to vector<1x8x8xf32>
    %51 = arith.mulf %49, %50 : vector<1x8x8xf32>
    %cst_16 = arith.constant dense<0xFF800000> : vector<1x8xf32>
    %52 = vector.multi_reduction <maximumf>, %51, %cst_16 [2] : vector<1x8x8xf32> to vector<1x8xf32>
    %53 = vector.shape_cast %52 : vector<1x8xf32> to vector<1x8x1xf32>
    %54 = vector.broadcast %53 : vector<1x8x1xf32> to vector<1x8x8xf32>
    %55 = arith.subf %51, %54 : vector<1x8x8xf32>
    %56 = math.exp %55 : vector<1x8x8xf32>
    %cst_17 = arith.constant dense<0.000000e+00> : vector<1x8xf32>
    %57 = vector.multi_reduction <add>, %56, %cst_17 [2] : vector<1x8x8xf32> to vector<1x8xf32>
    %58 = vector.shape_cast %57 : vector<1x8xf32> to vector<1x8x1xf32>
    %59 = tpu.reciprocal %58 {approx = true} : vector<1x8x1xf32> -> vector<1x8x1xf32>
    %60 = arith.mulf %58, %59 : vector<1x8x1xf32>
    %cst_18 = arith.constant 2.000000e+00 : f32
    %61 = vector.broadcast %cst_18 : f32 to vector<1x8x1xf32>
    %62 = arith.subf %61, %60 : vector<1x8x1xf32>
    %63 = arith.mulf %59, %62 : vector<1x8x1xf32>
    %64 = vector.broadcast %63 : vector<1x8x1xf32> to vector<1x8x8xf32>
    %65 = arith.mulf %56, %64 : vector<1x8x8xf32>
    %66 = arith.truncf %65 : vector<1x8x8xf32> to vector<1x8x8xbf16>
    %67 = arith.truncf %46 : vector<1x8x16xf32> to vector<1x8x16xbf16>
    "tpu.trace_start"() <{level = 10 : i32, message = "bqk,bkh->bqh"}> : () -> ()
    %cst_19 = arith.constant dense<0.000000e+00> : vector<1x8x16xf32>
    %68 = tpu.matmul %66, %67, %cst_19 {dimension_numbers = #tpu.dot_dimension_numbers<[2], [1], [1], [2], [0, 0, 0, 1, 1, 2], [0], [0]>} : vector<1x8x8xbf16>, vector<1x8x16xbf16>, vector<1x8x16xf32> -> vector<1x8x16xf32>
    "tpu.trace_stop"() : () -> ()
    %69 = vector.shape_cast %68 : vector<1x8x16xf32> to vector<8x16xf32>
    %70 = tpu.concatenate %40, %69 in 1 : vector<8x16xf32>, vector<8x16xf32> -> vector<8x32xf32>
    %71 = arith.truncf %70 : vector<8x32xf32> to vector<8x32xbf16>
    %c0_20 = arith.constant 0 : index
    %c0_21 = arith.constant 0 : index
    %c0_22 = arith.constant 0 : index
    %72 = vector.load %arg5[%c0_20, %c0_21, %c0_22] : memref<1x32x32xbf16, #tpu.memory_space<vmem>>, vector<1x32x32xbf16>
    %73 = vector.shape_cast %72 : vector<1x32x32xbf16> to vector<32x32xbf16>
    %cst_23 = arith.constant dense<0.000000e+00> : vector<8x32xf32>
    %74 = tpu.matmul %71, %73, %cst_23 {dimension_numbers = #tpu.dot_dimension_numbers<[1], [0], [0], [1], [0, 0, 1, 1], [], []>} : vector<8x32xbf16>, vector<32x32xbf16>, vector<8x32xf32> -> vector<8x32xf32>
    %c0_24 = arith.constant 0 : index
    %c0_25 = arith.constant 0 : index
    %c0_26 = arith.constant 0 : index
    %75 = vector.load %arg6[%c0_24, %c0_25, %c0_26] : memref<1x1x32xf32, #tpu.memory_space<vmem>>, vector<1x1x32xf32>
    %76 = vector.shape_cast %75 : vector<1x1x32xf32> to vector<1x32xf32>
    %77 = vector.broadcast %76 : vector<1x32xf32> to vector<8x32xf32>
    %78 = arith.addf %74, %77 : vector<8x32xf32>
    %79 = arith.addf %3, %78 : vector<8x32xf32>
    %c0_27 = arith.constant 0 : index
    %c0_28 = arith.constant 0 : index
    %c0_29 = arith.constant 0 : index
    %80 = vector.load %arg7[%c0_27, %c0_28, %c0_29] : memref<1x1x32xf32, #tpu.memory_space<vmem>>, vector<1x1x32xf32>
    %81 = vector.shape_cast %80 : vector<1x1x32xf32> to vector<1x32xf32>
    %c0_30 = arith.constant 0 : index
    %c0_31 = arith.constant 0 : index
    %c0_32 = arith.constant 0 : index
    %82 = vector.load %arg8[%c0_30, %c0_31, %c0_32] : memref<1x1x32xf32, #tpu.memory_space<vmem>>, vector<1x1x32xf32>
    %83 = vector.shape_cast %82 : vector<1x1x32xf32> to vector<1x32xf32>
    %cst_33 = arith.constant dense<0.000000e+00> : vector<8xf32>
    %84 = vector.multi_reduction <add>, %79, %cst_33 [1] : vector<8x32xf32> to vector<8xf32>
    %85 = vector.shape_cast %84 : vector<8xf32> to vector<8x1xf32>
    %cst_34 = arith.constant 3.200000e+01 : f32
    %86 = vector.broadcast %cst_34 : f32 to vector<8x1xf32>
    %87 = arith.divf %85, %86 : vector<8x1xf32>
    %88 = arith.mulf %79, %79 : vector<8x32xf32>
    %cst_35 = arith.constant dense<0.000000e+00> : vector<8xf32>
    %89 = vector.multi_reduction <add>, %88, %cst_35 [1] : vector<8x32xf32> to vector<8xf32>
    %90 = vector.shape_cast %89 : vector<8xf32> to vector<8x1xf32>
    %cst_36 = arith.constant 3.200000e+01 : f32
    %91 = vector.broadcast %cst_36 : f32 to vector<8x1xf32>
    %92 = arith.divf %90, %91 : vector<8x1xf32>
    %93 = arith.mulf %87, %87 : vector<8x1xf32>
    %94 = arith.subf %92, %93 : vector<8x1xf32>
    %95 = vector.broadcast %87 : vector<8x1xf32> to vector<8x32xf32>
    %96 = arith.subf %79, %95 : vector<8x32xf32>
    %cst_37 = arith.constant 9.99999974E-6 : f32
    %97 = vector.broadcast %cst_37 : f32 to vector<8x1xf32>
    %98 = arith.addf %94, %97 : vector<8x1xf32>
    %99 = math.rsqrt %98 : vector<8x1xf32>
    %100 = vector.broadcast %99 : vector<8x1xf32> to vector<8x32xf32>
    %101 = arith.mulf %96, %100 : vector<8x32xf32>
    %102 = vector.broadcast %81 : vector<1x32xf32> to vector<8x32xf32>
    %103 = arith.mulf %101, %102 : vector<8x32xf32>
    %104 = vector.broadcast %83 : vector<1x32xf32> to vector<8x32xf32>
    %105 = arith.addf %103, %104 : vector<8x32xf32>
    %106 = arith.truncf %105 : vector<8x32xf32> to vector<8x32xbf16>
    %c0_38 = arith.constant 0 : index
    %c0_39 = arith.constant 0 : index
    %c0_40 = arith.constant 0 : index
    %107 = vector.load %arg9[%c0_38, %c0_39, %c0_40] : memref<1x32x16xbf16, #tpu.memory_space<vmem>>, vector<1x32x16xbf16>
    %108 = vector.shape_cast %107 : vector<1x32x16xbf16> to vector<32x16xbf16>
    %cst_41 = arith.constant dense<0.000000e+00> : vector<8x16xf32>
    %109 = tpu.matmul %106, %108, %cst_41 {dimension_numbers = #tpu.dot_dimension_numbers<[1], [0], [0], [1], [0, 0, 1, 1], [], []>} : vector<8x32xbf16>, vector<32x16xbf16>, vector<8x16xf32> -> vector<8x16xf32>
    %c0_42 = arith.constant 0 : index
    %c0_43 = arith.constant 0 : index
    %c0_44 = arith.constant 0 : index
    %110 = vector.load %arg10[%c0_42, %c0_43, %c0_44] : memref<1x1x16xf32, #tpu.memory_space<vmem>>, vector<1x1x16xf32>
    %111 = vector.shape_cast %110 : vector<1x1x16xf32> to vector<1x16xf32>
    %112 = vector.broadcast %111 : vector<1x16xf32> to vector<8x16xf32>
    %113 = arith.addf %109, %112 : vector<8x16xf32>
    %cst_45 = arith.constant 0.000000e+00 : f32
    %114 = vector.broadcast %cst_45 : f32 to vector<8x16xf32>
    %115 = arith.maximumf %113, %114 : vector<8x16xf32>
    %116 = arith.truncf %115 : vector<8x16xf32> to vector<8x16xbf16>
    %c0_46 = arith.constant 0 : index
    %c0_47 = arith.constant 0 : index
    %c0_48 = arith.constant 0 : index
    %117 = vector.load %arg11[%c0_46, %c0_47, %c0_48] : memref<1x16x32xbf16, #tpu.memory_space<vmem>>, vector<1x16x32xbf16>
    %118 = vector.shape_cast %117 : vector<1x16x32xbf16> to vector<16x32xbf16>
    %cst_49 = arith.constant dense<0.000000e+00> : vector<8x32xf32>
    %119 = tpu.matmul %116, %118, %cst_49 {dimension_numbers = #tpu.dot_dimension_numbers<[1], [0], [0], [1], [0, 0, 1, 1], [], []>} : vector<8x16xbf16>, vector<16x32xbf16>, vector<8x32xf32> -> vector<8x32xf32>
    %c0_50 = arith.constant 0 : index
    %c0_51 = arith.constant 0 : index
    %c0_52 = arith.constant 0 : index
    %120 = vector.load %arg12[%c0_50, %c0_51, %c0_52] : memref<1x1x32xf32, #tpu.memory_space<vmem>>, vector<1x1x32xf32>
    %121 = vector.shape_cast %120 : vector<1x1x32xf32> to vector<1x32xf32>
    %122 = vector.broadcast %121 : vector<1x32xf32> to vector<8x32xf32>
    %123 = arith.addf %119, %122 : vector<8x32xf32>
    %124 = arith.addf %105, %123 : vector<8x32xf32>
    %c0_53 = arith.constant 0 : index
    %c0_54 = arith.constant 0 : index
    %c0_55 = arith.constant 0 : index
    %125 = vector.load %arg13[%c0_53, %c0_54, %c0_55] : memref<1x1x32xf32, #tpu.memory_space<vmem>>, vector<1x1x32xf32>
    %126 = vector.shape_cast %125 : vector<1x1x32xf32> to vector<1x32xf32>
    %c0_56 = arith.constant 0 : index
    %c0_57 = arith.constant 0 : index
    %c0_58 = arith.constant 0 : index
    %127 = vector.load %arg14[%c0_56, %c0_57, %c0_58] : memref<1x1x32xf32, #tpu.memory_space<vmem>>, vector<1x1x32xf32>
    %128 = vector.shape_cast %127 : vector<1x1x32xf32> to vector<1x32xf32>
    %cst_59 = arith.constant dense<0.000000e+00> : vector<8xf32>
    %129 = vector.multi_reduction <add>, %124, %cst_59 [1] : vector<8x32xf32> to vector<8xf32>
    %130 = vector.shape_cast %129 : vector<8xf32> to vector<8x1xf32>
    %cst_60 = arith.constant 3.200000e+01 : f32
    %131 = vector.broadcast %cst_60 : f32 to vector<8x1xf32>
    %132 = arith.divf %130, %131 : vector<8x1xf32>
    %133 = arith.mulf %124, %124 : vector<8x32xf32>
    %cst_61 = arith.constant dense<0.000000e+00> : vector<8xf32>
    %134 = vector.multi_reduction <add>, %133, %cst_61 [1] : vector<8x32xf32> to vector<8xf32>
    %135 = vector.shape_cast %134 : vector<8xf32> to vector<8x1xf32>
    %cst_62 = arith.constant 3.200000e+01 : f32
    %136 = vector.broadcast %cst_62 : f32 to vector<8x1xf32>
    %137 = arith.divf %135, %136 : vector<8x1xf32>
    %138 = arith.mulf %132, %132 : vector<8x1xf32>
    %139 = arith.subf %137, %138 : vector<8x1xf32>
    %140 = vector.broadcast %132 : vector<8x1xf32> to vector<8x32xf32>
    %141 = arith.subf %124, %140 : vector<8x32xf32>
    %cst_63 = arith.constant 9.99999974E-6 : f32
    %142 = vector.broadcast %cst_63 : f32 to vector<8x1xf32>
    %143 = arith.addf %139, %142 : vector<8x1xf32>
    %144 = math.rsqrt %143 : vector<8x1xf32>
    %145 = vector.broadcast %144 : vector<8x1xf32> to vector<8x32xf32>
    %146 = arith.mulf %141, %145 : vector<8x32xf32>
    %147 = vector.broadcast %126 : vector<1x32xf32> to vector<8x32xf32>
    %148 = arith.mulf %146, %147 : vector<8x32xf32>
    %149 = vector.broadcast %128 : vector<1x32xf32> to vector<8x32xf32>
    %150 = arith.addf %148, %149 : vector<8x32xf32>
    %c0_64 = arith.constant 0 : index
    %c0_65 = arith.constant 0 : index
    %151 = vector.load %arg15[%c0_64, %c0_65] : memref<8x32xf32, #tpu.memory_space<vmem>>, vector<8x32xf32>
    tpu.vector_store %arg15[%c0_64, %c0_65], %150 {strides = array<i32>} : memref<8x32xf32, #tpu.memory_space<vmem>>, vector<8x32xf32>,
    return
  }
  func.func @transform_0(%arg0: i32, %arg1: i32) -> (i32, i32) {
    %c0_i32 = arith.constant 0 : i32
    %c0_i32_0 = arith.constant 0 : i32
    return %arg0, %c0_i32 : i32, i32
  }
  func.func @transform_1(%arg0: i32, %arg1: i32) -> (i32, i32, i32) {
    %c0_i32 = arith.constant 0 : i32
    %c0_i32_0 = arith.constant 0 : i32
    %c0_i32_1 = arith.constant 0 : i32
    return %arg1, %c0_i32, %c0_i32_0 : i32, i32, i32
  }
  func.func @transform_2(%arg0: i32, %arg1: i32) -> (i32, i32, i32) {
    %c0_i32 = arith.constant 0 : i32
    %c0_i32_0 = arith.constant 0 : i32
    %c0_i32_1 = arith.constant 0 : i32
    return %arg1, %c0_i32, %c0_i32_0 : i32, i32, i32
  }
  func.func @transform_3(%arg0: i32, %arg1: i32) -> (i32, i32, i32) {
    %c0_i32 = arith.constant 0 : i32
    %c0_i32_0 = arith.constant 0 : i32
    %c0_i32_1 = arith.constant 0 : i32
    return %arg1, %c0_i32, %c0_i32_0 : i32, i32, i32
  }
  func.func @transform_4(%arg0: i32, %arg1: i32) -> (i32, i32, i32) {
    %c0_i32 = arith.constant 0 : i32
    %c0_i32_0 = arith.constant 0 : i32
    %c0_i32_1 = arith.constant 0 : i32
    return %arg1, %c0_i32, %c0_i32_0 : i32, i32, i32
  }
  func.func @transform_5(%arg0: i32, %arg1: i32) -> (i32, i32, i32) {
    %c0_i32 = arith.constant 0 : i32
    %c0_i32_0 = arith.constant 0 : i32
    %c0_i32_1 = arith.constant 0 : i32
    return %arg1, %c0_i32, %c0_i32_0 : i32, i32, i32
  }
  func.func @transform_6(%arg0: i32, %arg1: i32) -> (i32, i32, i32) {
    %c0_i32 = arith.constant 0 : i32
    %c0_i32_0 = arith.constant 0 : i32
    %c0_i32_1 = arith.constant 0 : i32
    return %arg1, %c0_i32, %c0_i32_0 : i32, i32, i32
  }
  func.func @transform_7(%arg0: i32, %arg1: i32) -> (i32, i32, i32) {
    %c0_i32 = arith.constant 0 : i32
    %c0_i32_0 = arith.constant 0 : i32
    %c0_i32_1 = arith.constant 0 : i32
    return %arg1, %c0_i32, %c0_i32_0 : i32, i32, i32
  }
  func.func @transform_8(%arg0: i32, %arg1: i32) -> (i32, i32, i32) {
    %c0_i32 = arith.constant 0 : i32
    %c0_i32_0 = arith.constant 0 : i32
    %c0_i32_1 = arith.constant 0 : i32
    return %arg1, %c0_i32, %c0_i32_0 : i32, i32, i32
  }
  func.func @transform_9(%arg0: i32, %arg1: i32) -> (i32, i32, i32) {
    %c0_i32 = arith.constant 0 : i32
    %c0_i32_0 = arith.constant 0 : i32
    %c0_i32_1 = arith.constant 0 : i32
    return %arg1, %c0_i32, %c0_i32_0 : i32, i32, i32
  }
  func.func @transform_10(%arg0: i32, %arg1: i32) -> (i32, i32, i32) {
    %c0_i32 = arith.constant 0 : i32
    %c0_i32_0 = arith.constant 0 : i32
    %c0_i32_1 = arith.constant 0 : i32
    return %arg1, %c0_i32, %c0_i32_0 : i32, i32, i32
  }
  func.func @transform_11(%arg0: i32, %arg1: i32) -> (i32, i32, i32) {
    %c0_i32 = arith.constant 0 : i32
    %c0_i32_0 = arith.constant 0 : i32
    %c0_i32_1 = arith.constant 0 : i32
    return %arg1, %c0_i32, %c0_i32_0 : i32, i32, i32
  }
  func.func @transform_12(%arg0: i32, %arg1: i32) -> (i32, i32, i32) {
    %c0_i32 = arith.constant 0 : i32
    %c0_i32_0 = arith.constant 0 : i32
    %c0_i32_1 = arith.constant 0 : i32
    return %arg1, %c0_i32, %c0_i32_0 : i32, i32, i32
  }
  func.func @transform_13(%arg0: i32, %arg1: i32) -> (i32, i32) {
    %c0_i32 = arith.constant 0 : i32
    %c0_i32_0 = arith.constant 0 : i32
    return %arg0, %c0_i32 : i32, i32
  }
}

</mosaic_0001>

<bundles_post_ra>
// kernel: tpu_custom_call.1
= control target key start
LH: loop header
LB: loop body
LE: loop exit
PB: predicated region body
PF: predicated region fallthrough
CT: control target
= control target key end

     0   :  { %s2322_s0 = inlined_call_operand.hbm [shape: f32[16,32], index: 0, kind: input, shape index: {}, may-alias: {0,13}]   ;;  %s2323_s1 = inlined_call_operand.vmem [shape: bf16[2,32,96], index: 1, kind: input, shape index: {}]   ;;  %s2324_s2 = inlined_call_operand.hbm [shape: f32[2,1,96], index: 2, kind: input, shape index: {}]   ;;  %s2325_s3 = inlined_call_operand.vmem [shape: bf16[2,32,32], index: 3, kind: input, shape index: {}]   ;;  %s2326_s4 = inlined_call_operand.vmem [shape: f32[2,1,32], index: 4, kind: input, shape index: {}]   ;;  %s2327_s5 = inlined_call_operand.vmem [shape: f32[2,1,32], index: 5, kind: input, shape index: {}]   ;;  %s2328_s6 = inlined_call_operand.hbm [shape: f32[2,1,32], index: 6, kind: input, shape index: {}]   ;;  %s2329_s7 = inlined_call_operand.vmem [shape: bf16[2,32,16], index: 7, kind: input, shape index: {}]   ;;  %s2330_s8 = inlined_call_operand.vmem [shape: f32[2,1,16], index: 8, kind: input, shape index: {}]   ;;  %s2331_s9 = inlined_call_operand.hbm [shape: bf16[2,16,32], index: 9, kind: input, shape index: {}]   ;;  %s2332_s10 = inlined_call_operand.vmem [shape: f32[2,1,32], index: 10, kind: input, shape index: {}]   ;;  %s2333_s11 = inlined_call_operand.vmem [shape: f32[2,1,32], index: 11, kind: input, shape index: {}]   ;;  %s2334_s12 = inlined_call_operand.hbm [shape: f32[2,1,32], index: 12, kind: input, shape index: {}]   ;;  %s2335_s13 = inlined_call_operand.hbm [shape: f32[16,32], index: 13, kind: output, shape index: {}, may-alias: {0,13}]  }
   0x1   :  { %2352 = sst [smem:[#allocation32_spill]] %s2322_s0 }
   0x2   :  { %2353 = sst [smem:[#allocation33_spill]] %s2323_s1 }
   0x3   :  { %2354 = sst [smem:[#allocation34_spill]] %s2324_s2 }
   0x4   :  { %2355 = sst [smem:[#allocation35_spill]] %s2325_s3 }
   0x5   :  { %2356 = sst [smem:[#allocation36_spill]] %s2326_s4 }
   0x6   :  { %2357 = sst [smem:[#allocation37_spill]] %s2327_s5 }
   0x7   :  { %2358 = sst [smem:[#allocation38_spill]] %s2328_s6 }
   0x8   :  { %2359 = sst [smem:[#allocation39_spill]] %s2329_s7 }
   0x9   :  { %2360 = sst [smem:[#allocation40_spill]] %s2330_s8 }
   0xa   :  { %2361 = sst [smem:[#allocation41_spill]] %s2331_s9 }
   0xb   :  { %2362 = sst [smem:[#allocation42_spill]] %s2332_s10 }
   0xc   :  { %2363 = sst [smem:[#allocation43_spill]] %s2333_s11 }
   0xd   :  { %2364 = sst [smem:[#allocation44_spill]] %s2334_s12 }
   0xe   :  { %2365 = sst [smem:[#allocation45_spill]] %s2335_s13 }
   0xf   :  { %18 = vsyncpa [#allocation3], 0 }
  0x10   :  { %20 = vsyncpa [#allocation3 + $0x1], 0 }
  0x11   :  { %21 = vsyncpa [#allocation6], 0 }
  0x12   :  { %23 = vsyncpa [#allocation6 + $0x1], 0 }
  0x13   :  { %24 = vsyncpa [#allocation9], 0 }
  0x14   :  { %26 = vsyncpa [#allocation9 + $0x1], 0 }
  0x15   :  { %27 = vsyncpa [#allocation4], 0 }
  0x16   :  { %29 = vsyncpa [#allocation4 + $0x1], 0  ;;  %s1937_s25 = smov 0   ;;  %s1939_s26 = smov 0  }
  0x17   :  { %s1941_s27 = smov 0   ;;  %s1943_s28 = smov 0  }
  0x18   :  { %s1945_s29 = smov 0   ;;  %s1947_s30 = smov 0  }
  0x19   :  { %s1949_s14 = smov 0   ;;  %s1951_s15 = smov 0  }
  0x1a   :  { %s1953_s16 = smov 0   ;;  %s1955_s17 = smov 0  }
  0x1b   :  { %s1957_s18 = smov 0  }
  0x1c LB: > { %2366 = sst [smem:[#allocation16_spill]] %s1820_s26  ;;  %s44_s19 = sadd.s32 1, %s1848_s16  ;;  %s1856_s18 = sphi %s1957_s18, %s35_s18   ;;  %s1852_s17 = sphi %s1955_s17, %s2429_s17   ;;  %s1848_s16 = sphi %s1953_s16, %s2428_s16   ;;  %s1844_s15 = sphi %s1951_s15, %s2427_s15   ;;  %s1840_s14 = sphi %s1949_s14, %s2426_s14   ;;  %s1836_s30 = sphi %s1947_s30, %s2425_s30   ;;  %s1832_s29 = sphi %s1945_s29, %s2424_s29   ;;  %s1828_s28 = sphi %s1943_s28, %s2423_s28   ;;  %s1824_s27 = sphi %s1941_s27, %s2422_s27   ;;  %s1820_s26 = sphi %s1939_s26, %s2421_s26   ;;  %s1816_s25 = sphi %s1937_s25, %s2420_s25  }
  0x1d   : > { %2367 = sst [smem:[#allocation17_spill]] %s1824_s27  ;;  %p62_p0 = scmp.eq.s32.totalorder %s1856_s18, 0 }
  0x1e   : > { %2368 = sst [smem:[#allocation18_spill]] %s1828_s28  ;;  %p1994_p1 = scmp.ge.s32.totalorder %s44_s19, 2 }
  0x1f   : > { %2369 = sst [smem:[#allocation19_spill]] %s1832_s29  ;;  %s106_s21 = sadd.s32 1, %s1824_s27 }
  0x20   : > { %2370 = sst [smem:[#allocation20_spill]] %s1836_s30  ;;  %p113_p2 = scmp.ne.s32.totalorder %s1824_s27, %s1820_s26 }
  0x21   : > { %2371 = sst [smem:[#allocation21_spill]] %s1840_s14  ;;  %p119_p3 = scmp.ne.s32.totalorder %s1820_s26, %s1816_s25 }
  0x22   : > { %2372 = sst [smem:[#allocation22_spill]] %s1844_s15  ;;  %s2431_s19 = smov (%p1994_p1, %s44_s19), 0 }
  0x23   : > { %2373 = sst [smem:[#allocation23_spill]] %s1848_s16  ;;  %p2009_p4 = por %p113_p2, %p62_p0 }
  0x24   : > { %2374 = sst [smem:[#allocation24_spill]] %s1852_s17  ;;  %s103_s23 = ssub.s32 %s1848_s16, %s2431_s19 }
  0x25   : > { %2375 = sst [smem:[#allocation25_spill]] %s1856_s18  ;;  %p1455_p5 = scmp.lt.s32.totalorder %s1856_s18, 4 }
  0x26   : > { %2377 = sst [smem:[#allocation26_spill]] %s2431_s19  ;;  %p104_p6 = scmp.eq.s32.totalorder %s103_s23, 0 }
  0x27   : > { %s456_s24 = sand.u32 1, %s1856_s18   ;;  %s2018_s13 = sand.u32 1, %s1824_s27  }
  0x28   : > { %s2021_s15 = scalar_select %p104_p6, %s1824_s27, %s106_s21  }
  0x29   : > { %s2380_s2 = sld [smem:[#allocation34_spill]]  ;;  %s459_s5 = scalar_lea.vmem [#allocation5], %s2018_s13 }
  0x2a   : > { %2379 = sst [smem:[#allocation27_spill]] %s2021_s15  ;;  %s466_s3 = sshll.u32 %s459_s5, 4  ;;  %s467_s3 = int_to_ptr.vmem [resolvable:$true] %s466_s3 }
  0x2b   : > { %p2032_p7 = pnand %p1455_p5, %p2009_p4  ;;  %p1361_p8 = scmp.ge.s32.totalorder %s1856_s18, 1 }
  0x2c   : > { %p573_p9 = scmp.lt.s32.totalorder %s1856_s18, 5  ;;  %s1358_s21 = sshll.u32 %s2018_s13, 3 }
  0x2d   : > { %s2039_s10 = scalar_lea.sflag [#allocation6], %s456_s24  ;;  %s528_s11 = scalar_lea.vmem [#allocation8], %s1358_s21 }
  0x2e   : > { %p2044_p10 = pnand %p1361_p8, %p573_p9  ;;  %s536_s22 = sshll.u32 %s528_s11, 4  ;;  %s537_s22 = int_to_ptr.vmem [resolvable:$true] %s536_s22 }
  0x2f   : > { %s462_s8 = scalar_lea.hbm %s2380_s2, %s1848_s16  ;;  %s2383_s9 = sld [smem:[#allocation41_spill]] }
  0x30   : > { %s464_s7 = sshll.u32 %s462_s8, 4  ;;  %s1412_s8 = sshll.u32 %s1848_s16, 3  ;;  %s465_s7 = int_to_ptr.hbm [resolvable:$true] %s464_s7 }
  0x31   : > { %1441 = dma.hbm_to_vmem [thread:$0]  (!%p2032_p7), %s465_s7, 16, %s467_s3, %s2039_s10  }
  0x32   : > { %s2052_s7 = scalar_lea.sflag [#allocation9], %s456_s24  ;;  %s1858_s27 = smov 64  }
  0x33   : > { %s1859_s21 = smov 4   ;;  %s2058_s11 = sadd.s32 4294967295, %s1856_s18  }
  0x34   : > { %s1353_s2 = sadd.s32 4294967294, %s1856_s18   ;;  %s47_s19 = sadd.s32 1, %s1852_s17 }
  0x35   : > { %s533_s15 = scalar_lea.hbm %s2383_s9, %s1412_s8  ;;  %s2433_s19 = smov (!%p1994_p1, %s47_s19), %s1852_s17 }
  0x36   : > { %s534_s3 = sshll.u32 %s533_s15, 4  ;;  %s54_s15 = sadd.s32 1, %s1836_s30  ;;  %s535_s3 = int_to_ptr.hbm [resolvable:$true] %s534_s3 }
  0x37   : > { %1447 = dma.hbm_to_vmem [thread:$0]  (!%p2032_p7), %s535_s3, 128, %s537_s22, %s2052_s7, %s1858_s27, %s1858_s27, %s1859_s21  }
  0x38   : > { %p61_p11 = scmp.ne.s32.totalorder %s1836_s30, %s1832_s29  ;;  %p67_p12 = scmp.ne.s32.totalorder %s1832_s29, %s1828_s28 }
  0x39   : > { %p49_p13 = scmp.ge.s32.totalorder %s2433_s19, 2  ;;  %p68_p2 = scmp.eq.s32.totalorder %s2058_s11, 0 }
  0x3a   : > { %p2073_p4 = por %p62_p0, %p61_p11  ;;  %p403_p6 = scmp.eq.s32.totalorder %s2058_s11, 3 }
  0x3b   : > { %s2435_s19 = smov (%p49_p13, %s2433_s19), 0  ;;  %p2083_p8 = por %p68_p2, %p67_p12 }
  0x3c   : > { %2385 = sst [smem:[#allocation28_spill]] %s2435_s19  ;;  %p2090_p1 = por %p119_p3, %p68_p2 }
  0x3d   : > { %s51_s8 = ssub.s32 %s1852_s17, %s2435_s19  ;;  %p2096_p0 = por %p403_p6, %p61_p11 }
  0x3e   : > { %p52_p9 = scmp.eq.s32.totalorder %s51_s8, 0  ;;  %p409_p13 = scmp.eq.s32.totalorder %s1353_s2, 3 }
  0x3f   : > { %s2388_s22 = scalar_select %p2096_p0, 1, 0 }
  0x40   : > { %s429_s3 = sand.u32 1, %s1836_s30   ;;  %s1357_s21 = sshll.u32 %s1852_s17, 3 }
  0x41   : > { %2389 = sst [smem:[#allocation29_spill]] %s2388_s22  ;;  %p2108_p3 = por %p409_p13, %p67_p12 }
  0x42   : > { %s2103_s9 = scalar_select %p52_p9, %s1836_s30, %s54_s15  }
  0x43   : > { %s2391_s25 = scalar_select %p2108_p3, 1, 0 }
  0x44   : > { %2390 = sst [smem:[#allocation30_spill]] %s2103_s9  ;;  %s1356_s1 = sshll.u32 %s429_s3, 3 }
  0x45   : > { %2392 = sst [smem:[#allocation31_spill]] %s2391_s25  ;;  %s433_s2 = scalar_lea.vmem [#allocation2], %s1356_s1 }
  0x46   : > { %s2393_s0 = sld [smem:[#allocation32_spill]]  ;;  %s441_s17 = sshll.u32 %s433_s2, 4  ;;  %s442_s17 = int_to_ptr.vmem [resolvable:$true] %s441_s17 }
  0x47   : > { %p1436_p11 = pnand %p1455_p5, %p2073_p4  ;;  %s2394_s6 = sld [smem:[#allocation38_spill]] }
  0x48   : > { %s430_s19 = scalar_lea.sflag [#allocation3], %s429_s3  ;;  %s2395_s12 = sld [smem:[#allocation44_spill]] }
  0x49   : > { %s2138_s9 = sand.u32 (!%p2044_p10), 1, %s1832_s29  }
  0x4c   : > { %s437_s14 = scalar_lea.hbm %s2393_s0, %s1357_s21  ;;  %s496_s21 = scalar_lea.vmem [#allocation7], %s2018_s13 }
  0x4d   : > { %s439_s8 = sshll.u32 %s437_s14, 4  ;;  %s499_s30 = scalar_lea.hbm %s2394_s6, %s1848_s16  ;;  %s440_s8 = int_to_ptr.hbm [resolvable:$true] %s439_s8 }
  0x4e   : > { %s501_s4 = sshll.u32 %s499_s30, 4  ;;  %s503_s14 = sshll.u32 %s496_s21, 4  ;;  %s502_s4 = int_to_ptr.hbm [resolvable:$true] %s501_s4  ;;  %s504_s14 = int_to_ptr.vmem [resolvable:$true] %s503_s14 }
  0x4f   : > { %1438 = dma.hbm_to_vmem [thread:$0]  (!%p1436_p11), %s440_s8, 128, %s442_s17, %s430_s19  }
  0x50   : > { %1444 = dma.hbm_to_vmem [thread:$0]  (!%p2032_p7), %s502_s4, 16, %s504_s14, %s2039_s10  }
  0x51   : > { %s564_s27 = scalar_lea.hbm %s2395_s12, %s1848_s16  ;;  %s561_s0 = scalar_lea.vmem [#allocation10], %s2018_s13 }
  0x52   : > { %s568_s25 = sshll.u32 %s561_s0, 4  ;;  %s566_s28 = sshll.u32 %s564_s27, 4  ;;  %s569_s25 = int_to_ptr.vmem [resolvable:$true] %s568_s25  ;;  %s567_s28 = int_to_ptr.hbm [resolvable:$true] %s566_s28 }
  0x53   : > { %1450 = dma.hbm_to_vmem [thread:$0]  (!%p2032_p7), %s567_s28, 16, %s569_s25, %s2052_s7  }
  0x54   : > { %577 = sbr.rel (%p2044_p10) target bundleno = 1724 (0x6bc), region = 72  ;;  %s1362_s30 = sshll.u32 (!%p2044_p10), %s2138_s9, 3 }
  0x55   : > { %s580_s17 = scalar_lea.sflag (!%p2044_p10), [#allocation3], %s2138_s9  ;;  %s583_s10 = scalar_lea.vmem (!%p2044_p10), [#allocation2], %s1362_s30 }
  0x59   : > { %1799 = dma.done.wait (%p2083_p8), %s580_s17, 128  }
  0x5a   : > { %1801 = vsyncadd (%p2083_p8), %s580_s17, 4294967168  ;;  %s589_s0 = sand.u32 1, %s2058_s11   ;;  %s2148_s13 = sand.u32 1, %s1820_s26  }
  0x5b   : > { %s590_s28 = scalar_lea.sflag [#allocation6], %s589_s0 }
  0x5c   : > { %1803 = dma.done.wait (%p2090_p1), %s590_s28, 32  }
  0x5d   : > { %1805 = vsyncadd (%p2090_p1), %s590_s28, 4294967264  ;;  %s1363_s5 = sshll.u32 %s2148_s13, 3  ;;  %s608_s20 = scalar_lea.sflag [#allocation9], %s589_s0 }
  0x5e   : > { %s2157_s3 = scalar_lea.vmem [#allocation8], %s1363_s5 }
  0x5f   : > { %1807 = dma.done.wait (%p2090_p1), %s608_s20, 144  }
  0x60   : > { %1809 = vsyncadd (%p2090_p1), %s608_s20, 4294967152  ;;  %s2396_s11 = sld [smem:[#allocation21_spill]]  ;;  %s620_s22 = scalar_lea.vmem [#allocation10], %s2148_s13 }
  0x61   : > { %s2398_s1 = sld [smem:[#allocation33_spill]]  ;;  %s2202_s5 = scalar_lea.vmem [#allocation11], %s1362_s30 }
  0x62   : > { %s2399_s0 = sld [smem:[#allocation35_spill]] }
  0x63   : > { %s2400_s7 = sld [smem:[#allocation37_spill]] }
  0x64   : > { %s2401_s16 = sld [smem:[#allocation39_spill]] }
  0x65   : > { %s2402_s19 = sld [smem:[#allocation40_spill]] }
  0x66   : > { %p711_p5 = scmp.lt.s32.totalorder %s2396_s11, 1  ;;  %p1371_p7 = scmp.ne.s32.totalorder %s2396_s11, 0 }
  0x68   : > { %s2165_s25 = scalar_select %p711_p5, %s2396_s11, 1 }
  0x6a   : > { %s1413_s8 = sshll.u32 %s2165_s25, 4  ;;  %s726_s23 = scalar_lea.vmem %s2400_s7, %s2165_s25 }
  0x6b   : > { %s715_s2 = scalar_lea.vmem %s2398_s1, %s1413_s8  ;;  %s2178_s28 = scalar_lea.vmem %s2399_s0, %s1413_s8 }
  0x6c   : > { %s2187_s29 = scalar_lea.vmem %s2401_s16, %s1413_s8  ;;  %s734_s21 = scalar_lea.vmem %s2402_s19, %s2165_s25 }
  0x6d   : > { %s2403_s1 = sld [smem:[#allocation42_spill]] }
  0x6e   : > { %s2404_s0 = sld [smem:[#allocation43_spill]] }
  0x70   : > { %745 = sbr.rel (%p1371_p7) target bundleno = 119 (0x77), region = 96 }
  0x73   : > { %s737_s26 = scalar_lea.vmem %s2403_s1, %s2165_s25 }
  0x74   : > { %s740_s18 = scalar_lea.vmem %s2404_s0, %s2165_s25 }
  0x75   : > { %v746_v0 = vld [vmem:[%s583_s10] sm:$0xff]  ;;  %vm747_vm0 = vcmask 261120  }
  0x76   : > { %748 = vst.msk [vmem:[%s2202_s5] sm:$0xff] %vm747_vm0, %v746_v0 }
  0x77 PF: > { %v1417_v1 = vld [vmem:[%s715_s2 + $0x8] sm:$0xff]  ;;  %v1416_v2 = vld [vmem:[%s715_s2] sm:$0xff]  ;;  %vm771_vm1 = vcmask 261120   ;;  %s2405_s6 = scalar_lea.vmem [#allocation5], %s2148_s13  ;;  %s1860_s12 = smov 112   ;;  %vm794_vm2 = vcmask 130048  }
  0x78   : > { %781 = vmatpush.bf16.msra.mxu0 %v1417_v1  ;;  %v1554_v5 = vld [vmem:[%s2405_s6] ss:$0 sm:$0xff]  ;;  %s1861_s16 = smov 96   ;;  %s1862_s30 = smov 80   ;;  %vm836_vm3 = vcmask 1043456   ;;  %vm815_vm4 = vcmask 64512  }
  0x79   : > { %s1863_s10 = smov 64   ;;  %s1864_s7 = smov 48   ;;  %v1419_v53 = vld [vmem:[%s2178_s28 + $0x8] sm:$0xff]  ;;  %v1418_v54 = vld [vmem:[%s2178_s28] sm:$0xff] }
  0x7a   : > { %s1865_s11 = smov 16   ;;  %s2406_s20 = sld [smem:[#allocation36_spill]] }
  0x7b   : > { %s1113_s8 = sshll.u32 %s2202_s5, 4  ;;  %s1114_s8 = int_to_ptr.vmem [resolvable:$true] %s1113_s8 }
  0x7c   : > { %782 = vmatpush.bf16.msra.mxu0 %v1416_v2 }
  0x7d   : > { %v2207_v3 = vld [vmem:[%s2202_s5] sm:$0xff] }
  0x7e   : > { %v750_v4 = vpack.c.bf16 %v2207_v3, %v2207_v3 }
  0x80   : > { %1380 = vmatmul.msk.bf16.vlgmr.msra.gmra.mxu0 %vm771_vm1, %v750_v4  ;;  %s2407_s15 = scalar_lea.vmem %s2406_s20, %s2165_s25  ;;  %s1101_s20 = scalar_lea.sflag [#allocation4], %s2138_s9 }
  0x81   : > { %948 = vmatpush.bf16.msrb.mxu0 %v1419_v53  ;;  %v1555_v62 = vld [vmem:[%s2407_s15] ss:$0 sm:$0xff] }
  0x85   : > { %949 = vmatpush.bf16.msrb.mxu0 %v1418_v54 }
  0xfd   : > { %v784_v6 = vpop.f32.mrf.mxu0 }
  0xfe   : > { %v785_v7 = vadd.f32 %v1554_v5, %v784_v6 }
 0x100   : > { %v788_v8 = vpack.c.bf16 %v785_v7, %v785_v7  ;;  %v1866_v7 = vmov 32.0  }
 0x102   : > { %v790_v9 = vunpack.c.l.b16 %v788_v8 }
 0x104   : > { %v791_v10 = vpack.c.b16 %v790_v9, %v790_v9 }
 0x105   : > { %v786_v11 = vpop.f32.mrf.mxu0 }
 0x106   : > { %853 = vrot.lane.b32.xlu1 %v791_v10, %s1860_s12  ;;  %792 = vrot.lane.b32.xlu0 %v791_v10, %s1861_s16 }
 0x10e   : > { %855 = vrot.lane.b32.xlu0 %v791_v10, %s1862_s30  ;;  %s2414_s30 = sld [smem:[#allocation45_spill]] }
 0x116   : > { %831 = vrot.lane.b32.xlu0 %v791_v10, %s1863_s10  ;;  %s2415_s10 = smov %s2414_s30 }
 0x11e   : > { %892 = vrot.lane.b32.xlu0 %v791_v10, %s1864_s7 }
 0x178   : > { %v793_v12 = vpop.permute.xlu0 %792  ;;  %v854_v16 = vpop.permute.xlu1 %853 }
 0x179   : > { %v799_v13 = vsel %vm794_vm2, %v793_v12, 0 }
 0x17a   : > { %808 = vmatpush.bf16.xpose.msra.mxu1 %v799_v13  ;;  %v1421_v13 = vld [vmem:[%s2187_s29 + $0x8] sm:$0xff] }
 0x180   : > { %v856_v14 = vpop.permute.xlu0 %855 }
 0x181   : > { %1381 = vmatmul.msk.bf16.vlgmr.msra.gmra.mxu1 %vm794_vm2, %v788_v8  ;;  %v861_v15 = vsel %vm794_vm2, %v856_v14, 0 }
 0x182   : > { %870 = vmatpush.bf16.xpose.msra.mxu3 %v861_v15  ;;  %1027 = vmatpush.bf16.msrb.mxu1 %v1421_v13 }
 0x188   : > { %v832_v17 = vpop.permute.xlu0 %831 }
 0x189   : > { %1383 = vmatmul.msk.bf16.vlgmr.msra.gmra.mxu3 %vm794_vm2, %v854_v16  ;;  %v838_v18 = vsel %vm836_vm3, %v832_v17, 0 }
 0x18a   : > { %847 = vmatpush.bf16.msra.mxu2 %v838_v18 }
 0x190   : > { %v893_v19 = vpop.permute.xlu0 %892 }
 0x191   : > { %v898_v20 = vsel %vm836_vm3, %v893_v19, 0 }
 0x192   : > { %907 = vmatpush.bf16.msrb.mxu2 %v898_v20  ;;  %v1422_v20 = vld [vmem:[%s2157_s3] sm:$0xff]  ;;  %s2409_s3 = scalar_lea.vmem [#allocation7], %s2148_s13 }
 0x193   : > { %1058 = vmatpush.bf16.msrb.mxu3 %v1422_v20 }
 0x1fe   : > { %v810_v21 = vpop.f32.mrf.mxu1 }
 0x1ff   : > { %v814_v22 = vmul.f32 0.25, %v810_v21 }
 0x201   : > { %v816_v23 = vsel %vm815_vm4, %v814_v22, -inf }
 0x202   : > { %817 = vmax.xlane.f32.xlu1 %v816_v23 }
 0x206   : > { %v812_v24 = vpop.f32.mrf.mxu1 }
 0x20c   : > { %v872_v25 = vpop.f32.mrf.mxu3 }
 0x20d   : > { %v876_v26 = vmul.f32 0.25, %v872_v25 }
 0x20f   : > { %v877_v27 = vsel %vm815_vm4, %v876_v26, -inf }
 0x210   : > { %878 = vmax.xlane.f32.xlu2 %v877_v27 }
 0x214   : > { %v874_v28 = vpop.f32.mrf.mxu3 }
 0x275   : > { %v818_v29 = vpop.xlane.xlu1 %817 }
 0x276   : > { %v819_v30 = vsub.f32 %v814_v22, %v818_v29 }
 0x278   : > { %v820_v31 = vmul.f32 1.442695, %v819_v30  ;;  %v1556_v30 = vld [vmem:[%s726_s23] ss:$0 sm:$0xff] }
 0x27a   : > { %1562 = vpow2.f32 %v820_v31 }
 0x280   : > { %v1563_v32 = vpop.eup %1562 }
 0x281   : > { %v822_v33 = vsel %vm815_vm4, %v1563_v32, 0.0 }
 0x282   : > { %823 = vadd.xlane.f32.xlu2 %v822_v33  ;;  %v1557_v33 = vld [vmem:[%s2409_s3] ss:$0 sm:$0xff] }
 0x283   : > { %v879_v34 = vpop.xlane.xlu2 %878 }
 0x284   : > { %v880_v35 = vsub.f32 %v876_v26, %v879_v34 }
 0x286   : > { %v881_v36 = vmul.f32 1.442695, %v880_v35 }
 0x288   : > { %1564 = vpow2.f32 %v881_v36 }
 0x28e   : > { %v1565_v37 = vpop.eup %1564 }
 0x28f   : > { %v883_v38 = vsel %vm815_vm4, %v1565_v37, 0.0 }
 0x290   : > { %884 = vadd.xlane.f32.xlu2 %v883_v38 }
 0x2f5   : > { %v824_v39 = vpop.xlane.xlu2 %823 }
 0x2f6   : > { %1566 = vrcp.f32 %v824_v39 }
 0x2fc   : > { %v1567_v40 = vpop.eup %1566 }
 0x2fd   : > { %v826_v41 = vmul.f32 %v1567_v40, %v824_v39 }
 0x2ff   : > { %v827_v42 = vsub.f32 2.0, %v826_v41 }
 0x301   : > { %v828_v43 = vmul.f32 %v1567_v40, %v827_v42 }
 0x303   : > { %v885_v44 = vpop.xlane.xlu2 %884  ;;  %v829_v45 = vmul.f32 %v1563_v32, %v828_v43  ;;  %v1559_v43 = vld [vmem:[%s737_s26] ss:$0 sm:$0xff] }
 0x304   : > { %1568 = vrcp.f32 %v885_v44 }
 0x305   : > { %v830_v46 = vpack.c.bf16 %v829_v45, %v829_v45  ;;  %1570 = vrcp.f32 %v1866_v7 }
 0x307   : > { %1382 = vmatmul.msk.bf16.vlgmr.msra.gmra.mxu2 %vm815_vm4, %v830_v46 }
 0x30a   : > { %v1569_v47 = vpop.eup %1568 }
 0x30b   : > { %v887_v48 = vmul.f32 %v1569_v47, %v885_v44  ;;  %v1571_v8 = vpop.eup %1570 }
 0x30c   : > { %v962_v9 = vmul.f32 32.0, %v1571_v8  ;;  %vm966_vm5 = vweird.f32 %v1571_v8 }
 0x30d   : > { %v888_v49 = vsub.f32 2.0, %v887_v48 }
 0x30e   : > { %v963_v10 = vsub.f32 1.0, %v962_v9 }
 0x30f   : > { %v889_v50 = vmul.f32 %v1569_v47, %v888_v49 }
 0x310   : > { %v964_v11 = vmul.f32 %v1571_v8, %v963_v10 }
 0x311   : > { %v890_v51 = vmul.f32 %v1565_v37, %v889_v50  ;;  %v1558_v37 = vld [vmem:[%s734_s21] ss:$0 sm:$0xff]  ;;  %s2412_s21 = sld [smem:[#allocation22_spill]] }
 0x312   : > { %v965_v12 = vadd.f32 %v1571_v8, %v964_v11 }
 0x313   : > { %v891_v52 = vpack.c.bf16 %v890_v51, %v890_v51 }
 0x314   : > { %v967_v14 = vsel %vm966_vm5, %v1571_v8, %v965_v12 }
 0x317   : > { %1384 = vmatmul.msk.bf16.vlgmr.msrb.gmra.mxu2 %vm815_vm4, %v891_v52  ;;  %s1409_s26 = sshll.u32 %s2412_s21, 3 }
 0x318   : > { %s1111_s7 = scalar_lea.hbm %s2414_s30, %s1409_s26 }
 0x319   : > { %s1115_s2 = sshll.u32 %s1111_s7, 4  ;;  %s1116_s2 = int_to_ptr.hbm [resolvable:$true] %s1115_s2 }
 0x31a   : > { %s1740_s25 = sshra.s32 %s1116_s2, 4  ;;  %s1741_s25 = int_to_ptr.hbm [resolvable:$true] %s1740_s25 }
 0x31b   : > { %p1747_p4 = scmp.lt.s32.totalorder %s1741_s25, %s2415_s10 }
 0x38a   : > { %v849_v55 = vpop.f32.mrf.mxu2 }
 0x392   : > { %v851_v56 = vpop.f32.mrf.mxu2 }
 0x39a   : > { %v909_v57 = vpop.f32.mrf.mxu2 }
 0x39b   : > { %914 = vrot.lane.b32.xlu2 %v909_v57, %s1865_s11 }
 0x3a2   : > { %v911_v58 = vpop.f32.mrf.mxu2 }
 0x3f5   : > { %v915_v59 = vpop.permute.xlu2 %914 }
 0x3f6   : > { %v917_v60 = vsel %vm794_vm2, %v849_v55, %v915_v59 }
 0x3f7   : > { %v918_v61 = vpack.c.bf16 %v917_v60, %v917_v60 }
 0x3f9   : > { %1393 = vmatmul.msk.bf16.vlgmr.msrb.gmra.mxu0 %vm771_vm1, %v918_v61 }
 0x476   : > { %v951_v63 = vpop.f32.mrf.mxu0 }
 0x477   : > { %v952_v0 = vadd.f32 %v1555_v62, %v951_v63 }
 0x479   : > { %v955_v1 = vadd.f32 %v952_v0, %v2207_v3  ;;  %v1420_v3 = vld [vmem:[%s2187_s29] sm:$0xff] }
 0x47a   : > { %1028 = vmatpush.bf16.msrb.mxu1 %v1420_v3 }
 0x47b   : > { %v958_v2 = vsel %vm771_vm1, %v955_v1, 0.0  ;;  %v969_v4 = vmul.f32 %v955_v1, %v955_v1 }
 0x47c   : > { %959 = vadd.xlane.f32.xlu0 %v958_v2 }
 0x47d   : > { %v970_v5 = vsel %vm771_vm1, %v969_v4, 0.0 }
 0x47e   : > { %v953_v6 = vpop.f32.mrf.mxu0  ;;  %971 = vadd.xlane.f32.xlu2 %v970_v5  ;;  %v1561_v5 = vld [vmem:[%s620_s22] ss:$0 sm:$0xff]  ;;  %s1746_s22 = scalar_lea.hbm %s2415_s10, 16 }
 0x4ef   : > { %v960_v15 = vpop.xlane.xlu0 %959 }
 0x4f0   : > { %v968_v16 = vmul.f32 %v967_v14, %v960_v15 }
 0x4f1   : > { %v972_v17 = vpop.xlane.xlu2 %971 }
 0x4f2   : > { %v974_v18 = vmul.f32 %v968_v16, %v968_v16  ;;  %v973_v19 = vmul.f32 %v972_v17, %v967_v14  ;;  %v976_v29 = vsub.f32 %v955_v1, %v968_v16  ;;  %v1560_v1 = vld [vmem:[%s740_s18] ss:$0 sm:$0xff]  ;;  %s1742_s18 = scalar_lea.hbm %s1741_s25, 8 }
 0x4f3   : > { %p1743_p10 = scmp.ne.s32.totalorder %s1741_s25, %s1742_s18  ;;  %p1748_p6 = scmp.lt.s32.totalorder %s1746_s22, %s1742_s18 }
 0x4f4   : > { %v975_v21 = vsub.f32 %v973_v19, %v974_v18 }
 0x4f5   : > { %p1744_p12 = pnand %p1743_p10, %p2096_p0  ;;  %p1749_p8 = por %p1748_p6, %p1747_p4 }
 0x4f6   : > { %v977_v22 = vadd.f32 1e-05, %v975_v21 }
 0x4f7   : > { %p1745_p2 = pneg %p1744_p12 }
 0x4f8   : > { %1572 = vrsqrt.f32 %v977_v22  ;;  %vm984_vm7 = vweird.f32 %v977_v22 }
 0x4f9   : > { %p1750_p1 = pnand %p1749_p8, %p1745_p2 }
 0x4fe   : > { %v1573_v23 = vpop.eup %1572 }
 0x4ff   : > { %v979_v24 = vmul.f32 %v1573_v23, %v977_v22  ;;  %vm985_vm6 = vweird.f32 %v1573_v23 }
 0x500   : > { %vm986_vm8 = vmor %vm984_vm7, %vm985_vm6 }
 0x501   : > { %v980_v25 = vmul.f32 %v1573_v23, %v979_v24 }
 0x503   : > { %v981_v26 = vmul.f32 0.5, %v980_v25 }
 0x505   : > { %v982_v27 = vsub.f32 1.5, %v981_v26 }
 0x507   : > { %v983_v28 = vmul.f32 %v1573_v23, %v982_v27 }
 0x509   : > { %v987_v31 = vsel %vm986_vm8, %v1573_v23, %v983_v28 }
 0x50a   : > { %v988_v32 = vmul.f32 %v987_v31, %v976_v29 }
 0x50c   : > { %v992_v34 = vmul.f32 %v1556_v30, %v988_v32 }
 0x50e   : > { %v996_v35 = vadd.f32 %v1557_v33, %v992_v34 }
 0x510   : > { %v997_v36 = vpack.c.bf16 %v996_v35, %v996_v35 }
 0x512   : > { %1402 = vmatmul.msk.bf16.vlgmr.msrb.gmra.mxu1 %vm771_vm1, %v997_v36 }
 0x58f   : > { %v1030_v38 = vpop.f32.mrf.mxu1 }
 0x590   : > { %v1031_v39 = vadd.f32 %v1558_v37, %v1030_v38 }
 0x592   : > { %v1034_v40 = vmax.f32 %v1031_v39, 0.0 }
 0x594   : > { %v1035_v41 = vpack.c.bf16 %v1034_v40, %v1034_v40 }
 0x596   : > { %1407 = vmatmul.msk.bf16.vlgmr.msrb.gmra.mxu3 %vm794_vm2, %v1035_v41 }
 0x597   : > { %v1032_v42 = vpop.f32.mrf.mxu1 }
 0x619   : > { %v1060_v44 = vpop.f32.mrf.mxu3 }
 0x61a   : > { %v1061_v45 = vadd.f32 %v1559_v43, %v1060_v44 }
 0x61c   : > { %v1064_v46 = vadd.f32 %v1061_v45, %v996_v35 }
 0x61e   : > { %v1067_v47 = vsel %vm771_vm1, %v1064_v46, 0.0  ;;  %v1071_v49 = vmul.f32 %v1064_v46, %v1064_v46 }
 0x61f   : > { %1068 = vadd.xlane.f32.xlu1 %v1067_v47 }
 0x620   : > { %v1072_v50 = vsel %vm771_vm1, %v1071_v49, 0.0 }
 0x621   : > { %v1062_v48 = vpop.f32.mrf.mxu3 }
 0x627   : > { %1073 = vadd.xlane.f32.xlu1 %v1072_v50 }
 0x692   : > { %v1069_v51 = vpop.xlane.xlu1 %1068 }
 0x693   : > { %v1070_v52 = vmul.f32 %v1069_v51, %v967_v14 }
 0x695   : > { %v1076_v54 = vmul.f32 %v1070_v52, %v1070_v52  ;;  %v1078_v0 = vsub.f32 %v1064_v46, %v1070_v52 }
 0x69a   : > { %v1074_v53 = vpop.xlane.xlu1 %1073 }
 0x69b   : > { %v1075_v55 = vmul.f32 %v1074_v53, %v967_v14 }
 0x69d   : > { %v1077_v56 = vsub.f32 %v1075_v55, %v1076_v54 }
 0x69f   : > { %v1079_v57 = vadd.f32 1e-05, %v1077_v56 }
 0x6a1   : > { %1574 = vrsqrt.f32 %v1079_v57  ;;  %vm1086_vm10 = vweird.f32 %v1079_v57 }
 0x6a7   : > { %v1575_v58 = vpop.eup %1574 }
 0x6a8   : > { %v1081_v59 = vmul.f32 %v1575_v58, %v1079_v57  ;;  %vm1087_vm9 = vweird.f32 %v1575_v58 }
 0x6a9   : > { %vm1088_vm11 = vmor %vm1086_vm10, %vm1087_vm9 }
 0x6aa   : > { %v1082_v60 = vmul.f32 %v1575_v58, %v1081_v59 }
 0x6ac   : > { %v1083_v61 = vmul.f32 0.5, %v1082_v60 }
 0x6ae   : > { %v1084_v62 = vsub.f32 1.5, %v1083_v61 }
 0x6b0   : > { %v1085_v63 = vmul.f32 %v1575_v58, %v1084_v62 }
 0x6b2   : > { %v1089_v2 = vsel %vm1088_vm11, %v1575_v58, %v1085_v63 }
 0x6b3   : > { %v1090_v4 = vmul.f32 %v1089_v2, %v1078_v0 }
 0x6b5   : > { %v1094_v6 = vmul.f32 %v1560_v1, %v1090_v4 }
 0x6b7   : > { %v1098_v7 = vadd.f32 %v1561_v5, %v1094_v6 }
 0x6b9   : > { %1099 = vst.msk [vmem:[%s2202_s5] sm:$0xff] %vm771_vm1, %v1098_v7 }
 0x6ba   : > { %1753 = shalt.err (!%p1750_p1)
}
 0x6bb   : > { %1433 = dma.vmem_to_hbm [thread:$0]  (%p2096_p0), %s1114_s8, 128, %s1116_s2, %s1101_s20  }
 0x6bc PF: > { %s2417_s9 = sld [smem:[#allocation25_spill]] }
 0x6bd   : > { %s2418_s5 = sld [smem:[#allocation18_spill]] }
 0x6c2   : > { %p1456_p9 = scmp.ge.s32.totalorder %s2417_s9, 2 }
 0x6c3   : > { %s1127_s3 = sand.u32 1, %s2418_s5  }
 0x6c4   : > { %p1452_p13 = pnand %p1456_p9, %p2108_p3  ;;  %s1128_s19 = scalar_lea.sflag [#allocation4], %s1127_s3 }
 0x6c6   : > { %p1453_p11 = pneg %p1452_p13 }
 0x6c8   : > { %1811 = dma.done.wait (%p1453_p11), %s1128_s19, 128  }
 0x6c9   : > { %1813 = vsyncadd (%p1453_p11), %s1128_s19, 4294967168  ;;  %s35_s18 = sadd.s32 1, %s2417_s9   ;;  %s2420_s25 = sld [smem:[#allocation16_spill]] }
 0x6ca   : > { %p32_p5 = scmp.ge.s32.totalorder %s35_s18, 6   ;;  %s2421_s26 = sld [smem:[#allocation17_spill]] }
 0x6cb   : > { %s2422_s27 = sld [smem:[#allocation27_spill]] }
 0x6cc   : > { %s2423_s28 = sld [smem:[#allocation19_spill]] }
 0x6cd   : > { %s2424_s29 = sld [smem:[#allocation20_spill]] }
 0x6ce   : > { %s2425_s30 = sld [smem:[#allocation30_spill]]  ;;  %34 = sbr.rel (!%p32_p5) target bundleno = 28 (0x1c), region = 193 }
 0x6cf   : > { %s2426_s14 = sld [smem:[#allocation23_spill]] }
 0x6d0   : > { %s2427_s15 = sld [smem:[#allocation24_spill]] }
 0x6d1   : > { %s2428_s16 = sld [smem:[#allocation26_spill]] }
 0x6d2   : > { %s2429_s17 = sld [smem:[#allocation28_spill]] }
 0x6d3   :  { %1134 = vsyncpa [#allocation3], 1 }
 0x6d4   :  { %1136 = vsyncpa [#allocation3 + $0x1], 1 }
 0x6d5   :  { %1137 = vsyncpa [#allocation6], 1 }
 0x6d6   :  { %1139 = vsyncpa [#allocation6 + $0x1], 1 }
 0x6d7   :  { %1140 = vsyncpa [#allocation9], 1 }
 0x6d8   :  { %1142 = vsyncpa [#allocation9 + $0x1], 1 }
 0x6d9   :  { %1143 = vsyncpa [#allocation4], 1 }
 0x6da   :  { %1145 = vsyncpa [#allocation4 + $0x1], 1 }

</bundles_post_ra>
